<compile_context>
chip_gen: v7x
topology: tpu7x:2x2x1
jax: 0.10.0
libtpu: 0.0.40
codegen_flags: <defaults>
</compile_context>

<pallas_src>
import jax
import jax.numpy as jnp
from jax import lax
from jax.experimental import pallas as pl
from jax.experimental.pallas import tpu as pltpu


def _round_up(x, m):
    return ((x + m - 1) // m) * m


def _mlp_kernel(x_ref, w1_ref, b1_ref, w2_ref, b2_ref, w3_ref, b3_ref, o_ref):
    # x: (tn, input_dim) natural-layout tile; upcast in-kernel (never in wrapper).
    x = x_ref[...].astype(jnp.float32)

    # Layer 1: h1 = relu(W1 @ x^T + b1) -> (nf, tn).  Contracting last dims of
    # (nf, in) and (tn, in) is the MXU-native trans-RHS form; batch stays on
    # the 128-lane axis from here on (lane-dense activations, no padding).
    h1 = lax.dot_general(w1_ref[...], x, (((1,), (1,)), ((), ())),
                         preferred_element_type=jnp.float32) + b1_ref[...]
    h1 = jnp.maximum(h1, 0.0)

    # Layer 2: (nf, nf) @ (nf, tn) -> (nf, tn)
    h2 = jnp.dot(w2_ref[...], h1, preferred_element_type=jnp.float32) + b2_ref[...]
    h2 = jnp.maximum(h2, 0.0)

    # Layer 3: (3, nf) @ (nf, tn) -> (3, tn); unmasked lane-dense store.
    y = jnp.dot(w3_ref[...], h2, preferred_element_type=jnp.float32) + b3_ref[...]
    o_ref[...] = y.astype(o_ref.dtype)


def depthnet4_xyz_forward(x_nchw, params, *, tile_n=16384):
    """x_nchw: (N, nF, H, W) with nF*H*W == input_dim. Returns (N, 3) float32."""
    (w1, b1, w2, b2, w3, b3) = params
    N = x_nchw.shape[0]

    # Free reshape (matches x.view(N, -1)); no transpose / pad / cast of x.
    x2d = x_nchw.reshape(N, -1)
    input_dim = x2d.shape[1]

    if N >= 128:
        tn_cap = (N // 128) * 128                 # 128-aligned and block <= array
        tn_two = _round_up(-(-N // 2), 128)       # aim for >=2 grid steps (megacore)
        tn = max(128, min(tile_n, tn_cap, tn_two))
    else:
        tn = N                                    # single full-array block, no pad

    grid = (pl.cdiv(N, tn),)                      # ragged tail handled by Pallas
    const = lambda i: (0, 0)

    nf1, nf2, nout = w1.shape[0], w2.shape[0], w3.shape[0]
    flops = 2 * N * (input_dim * nf1 + nf1 * nf2 + nf2 * nout)
    bytes_accessed = (x2d.size * x2d.dtype.itemsize + N * nout * 4
                      + sum(int(a.size) * a.dtype.itemsize for a in params))

    out_t = pl.pallas_call(
        _mlp_kernel,
        out_shape=jax.ShapeDtypeStruct((nout, N), jnp.float32),
        grid=grid,
        in_specs=[
            pl.BlockSpec((tn, input_dim), lambda i: (i, 0)),   # streamed x tiles
            pl.BlockSpec(w1.shape, const),                     # resident weights
            pl.BlockSpec(b1.shape, const),
            pl.BlockSpec(w2.shape, const),
            pl.BlockSpec(b2.shape, const),
            pl.BlockSpec(w3.shape, const),
            pl.BlockSpec(b3.shape, const),
        ],
        out_specs=pl.BlockSpec((nout, tn), lambda i: (0, i)),  # lane-dense stores
        compiler_params=pltpu.CompilerParams(
            dimension_semantics=("parallel",),                 # megacore on v7x
            vmem_limit_bytes=48 * 1024 * 1024),
        cost_estimate=pl.CostEstimate(
            flops=flops, transcendentals=0, bytes_accessed=bytes_accessed),
    )(x2d, w1, b1, w2, b2, w3, b3)

    return out_t.T                                             # (N, 3)


def init_params(key, input_dim=32, num_features=16):
    """nn.Linear-style U(-1/sqrt(fan_in), 1/sqrt(fan_in)) init.
    Weights stored PyTorch-style (out_features, in_features); biases (out, 1)."""
    dims = [(num_features, input_dim),
            (num_features, num_features),
            (3, num_features)]
    params = []
    for (fan_out, fan_in) in dims:
        key, kw, kb = jax.random.split(key, 3)
        bound = 1.0 / float(fan_in) ** 0.5
        w = jax.random.uniform(kw, (fan_out, fan_in), jnp.float32, -bound, bound)
        b = jax.random.uniform(kb, (fan_out, 1), jnp.float32, -bound, bound)
        params += [w, b]
    return tuple(params)


def reference_forward(x_nchw, params):
    """Pure-JAX reference (mirrors the PyTorch module) for correctness check."""
    (w1, b1, w2, b2, w3, b3) = params
    x = x_nchw.reshape(x_nchw.shape[0], -1).astype(jnp.float32)
    x = jnp.maximum(x @ w1.T + b1.T, 0.0)
    x = jnp.maximum(x @ w2.T + b2.T, 0.0)
    return x @ w3.T + b3.T


if __name__ == "__main__":
    key = jax.random.PRNGKey(0)
    k_params, k_x1, k_x2 = jax.random.split(key, 3)

    input_dim, num_features = 32, 16
    params = init_params(k_params, input_dim=input_dim, num_features=num_features)

    # Small shape implied by the module: (N, nF, H, W) with nF*H*W == input_dim.
    N, nF, H, W = 2, 2, 4, 4
    x = jax.random.normal(k_x1, (N, nF, H, W), jnp.float32)
    out = jax.block_until_ready(depthnet4_xyz_forward(x, params))
    ref = reference_forward(x, params)
    assert out.shape == (N, 3), out.shape
    assert jnp.allclose(out, ref, atol=1e-4, rtol=1e-4), "mismatch vs reference (small)"

    # Also exercise the optimized tiled path (multi-step grid + ragged tail).
    N2 = 333
    x2 = jax.random.normal(k_x2, (N2, nF, H, W), jnp.float32)
    out2 = jax.block_until_ready(depthnet4_xyz_forward(x2, params))
    ref2 = reference_forward(x2, params)
    assert out2.shape == (N2, 3), out2.shape
    assert jnp.allclose(out2, ref2, atol=1e-4, rtol=1e-4), "mismatch vs reference (tiled)"

    print("KERNEL_OK")
</pallas_src>

<mosaic_0001>
module attributes {stable_mosaic.version = 11 : i64} {
  func.func @_mlp_kernel(%arg0: i32, %arg1: memref<2x32xf32, #tpu.memory_space<vmem>>, %arg2: memref<16x32xf32, #tpu.memory_space<vmem>>, %arg3: memref<16x1xf32, #tpu.memory_space<vmem>>, %arg4: memref<16x16xf32, #tpu.memory_space<vmem>>, %arg5: memref<16x1xf32, #tpu.memory_space<vmem>>, %arg6: memref<3x16xf32, #tpu.memory_space<vmem>>, %arg7: memref<3x1xf32, #tpu.memory_space<vmem>>, %arg8: memref<3x2xf32, #tpu.memory_space<vmem>>) attributes {dimension_semantics = [#tpu.dimension_semantics<parallel>], iteration_bounds = array<i64: 1>, scalar_prefetch = 0 : i64, scratch_operands = 0 : i64, tpu.core_type = #tpu.core_type<tc>, window_params = [{transform_indices = @transform_0, window_bounds = array<i64: 2, 32>}, {pipeline_mode = #tpu.pipeline_mode<synchronous>, transform_indices = @transform_1, window_bounds = array<i64: 16, 32>}, {pipeline_mode = #tpu.pipeline_mode<synchronous>, transform_indices = @transform_2, window_bounds = array<i64: 16, 1>}, {pipeline_mode = #tpu.pipeline_mode<synchronous>, transform_indices = @transform_3, window_bounds = array<i64: 16, 16>}, {pipeline_mode = #tpu.pipeline_mode<synchronous>, transform_indices = @transform_4, window_bounds = array<i64: 16, 1>}, {pipeline_mode = #tpu.pipeline_mode<synchronous>, transform_indices = @transform_5, window_bounds = array<i64: 3, 16>}, {pipeline_mode = #tpu.pipeline_mode<synchronous>, transform_indices = @transform_6, window_bounds = array<i64: 3, 1>}, {transform_indices = @transform_7, window_bounds = array<i64: 3, 2>}]} {
    %c0 = arith.constant 0 : index
    %c0_0 = arith.constant 0 : index
    %0 = vector.load %arg1[%c0, %c0_0] : memref<2x32xf32, #tpu.memory_space<vmem>>, vector<2x32xf32>
    %c0_1 = arith.constant 0 : index
    %c0_2 = arith.constant 0 : index
    %1 = vector.load %arg2[%c0_1, %c0_2] : memref<16x32xf32, #tpu.memory_space<vmem>>, vector<16x32xf32>
    %cst = arith.constant dense<0.000000e+00> : vector<16x2xf32>
    %2 = tpu.matmul %1, %0, %cst {dimension_numbers = #tpu.dot_dimension_numbers<[1], [1], [0], [0], [0, 0, 1, 0], [], []>} : vector<16x32xf32>, vector<2x32xf32>, vector<16x2xf32> -> vector<16x2xf32>
    %c0_3 = arith.constant 0 : index
    %c0_4 = arith.constant 0 : index
    %3 = vector.load %arg3[%c0_3, %c0_4] : memref<16x1xf32, #tpu.memory_space<vmem>>, vector<16x1xf32>
    %4 = vector.broadcast %3 : vector<16x1xf32> to vector<16x2xf32>
    %5 = arith.addf %2, %4 : vector<16x2xf32>
    %cst_5 = arith.constant 0.000000e+00 : f32
    %6 = vector.broadcast %cst_5 : f32 to vector<16x2xf32>
    %7 = arith.maximumf %5, %6 : vector<16x2xf32>
    %c0_6 = arith.constant 0 : index
    %c0_7 = arith.constant 0 : index
    %8 = vector.load %arg4[%c0_6, %c0_7] : memref<16x16xf32, #tpu.memory_space<vmem>>, vector<16x16xf32>
    %cst_8 = arith.constant dense<0.000000e+00> : vector<16x2xf32>
    %9 = tpu.matmul %8, %7, %cst_8 {dimension_numbers = #tpu.dot_dimension_numbers<[1], [0], [0], [1], [0, 0, 1, 1], [], []>} : vector<16x16xf32>, vector<16x2xf32>, vector<16x2xf32> -> vector<16x2xf32>
    %c0_9 = arith.constant 0 : index
    %c0_10 = arith.constant 0 : index
    %10 = vector.load %arg5[%c0_9, %c0_10] : memref<16x1xf32, #tpu.memory_space<vmem>>, vector<16x1xf32>
    %11 = vector.broadcast %10 : vector<16x1xf32> to vector<16x2xf32>
    %12 = arith.addf %9, %11 : vector<16x2xf32>
    %cst_11 = arith.constant 0.000000e+00 : f32
    %13 = vector.broadcast %cst_11 : f32 to vector<16x2xf32>
    %14 = arith.maximumf %12, %13 : vector<16x2xf32>
    %c0_12 = arith.constant 0 : index
    %c0_13 = arith.constant 0 : index
    %15 = vector.load %arg6[%c0_12, %c0_13] : memref<3x16xf32, #tpu.memory_space<vmem>>, vector<3x16xf32>
    %cst_14 = arith.constant dense<0.000000e+00> : vector<3x2xf32>
    %16 = tpu.matmul %15, %14, %cst_14 {dimension_numbers = #tpu.dot_dimension_numbers<[1], [0], [0], [1], [0, 0, 1, 1], [], []>} : vector<3x16xf32>, vector<16x2xf32>, vector<3x2xf32> -> vector<3x2xf32>
    %c0_15 = arith.constant 0 : index
    %c0_16 = arith.constant 0 : index
    %17 = vector.load %arg7[%c0_15, %c0_16] : memref<3x1xf32, #tpu.memory_space<vmem>>, vector<3x1xf32>
    %18 = vector.broadcast %17 : vector<3x1xf32> to vector<3x2xf32>
    %19 = arith.addf %16, %18 : vector<3x2xf32>
    %c0_17 = arith.constant 0 : index
    %c0_18 = arith.constant 0 : index
    %20 = vector.load %arg8[%c0_17, %c0_18] : memref<3x2xf32, #tpu.memory_space<vmem>>, vector<3x2xf32>
    tpu.vector_store %arg8[%c0_17, %c0_18], %19 {strides = array<i32>} : memref<3x2xf32, #tpu.memory_space<vmem>>, vector<3x2xf32>,
    return
  }
  func.func @transform_0(%arg0: i32) -> (i32, i32) {
    %c0_i32 = arith.constant 0 : i32
    %c0_i32_0 = arith.constant 0 : i32
    return %arg0, %c0_i32 : i32, i32
  }
  func.func @transform_1(%arg0: i32) -> (i32, i32) {
    %c0_i32 = arith.constant 0 : i32
    %c0_i32_0 = arith.constant 0 : i32
    %c0_i32_1 = arith.constant 0 : i32
    return %c0_i32, %c0_i32_0 : i32, i32
  }
  func.func @transform_2(%arg0: i32) -> (i32, i32) {
    %c0_i32 = arith.constant 0 : i32
    %c0_i32_0 = arith.constant 0 : i32
    %c0_i32_1 = arith.constant 0 : i32
    return %c0_i32, %c0_i32_0 : i32, i32
  }
  func.func @transform_3(%arg0: i32) -> (i32, i32) {
    %c0_i32 = arith.constant 0 : i32
    %c0_i32_0 = arith.constant 0 : i32
    %c0_i32_1 = arith.constant 0 : i32
    return %c0_i32, %c0_i32_0 : i32, i32
  }
  func.func @transform_4(%arg0: i32) -> (i32, i32) {
    %c0_i32 = arith.constant 0 : i32
    %c0_i32_0 = arith.constant 0 : i32
    %c0_i32_1 = arith.constant 0 : i32
    return %c0_i32, %c0_i32_0 : i32, i32
  }
  func.func @transform_5(%arg0: i32) -> (i32, i32) {
    %c0_i32 = arith.constant 0 : i32
    %c0_i32_0 = arith.constant 0 : i32
    %c0_i32_1 = arith.constant 0 : i32
    return %c0_i32, %c0_i32_0 : i32, i32
  }
  func.func @transform_6(%arg0: i32) -> (i32, i32) {
    %c0_i32 = arith.constant 0 : i32
    %c0_i32_0 = arith.constant 0 : i32
    %c0_i32_1 = arith.constant 0 : i32
    return %c0_i32, %c0_i32_0 : i32, i32
  }
  func.func @transform_7(%arg0: i32) -> (i32, i32) {
    %c0_i32 = arith.constant 0 : i32
    %c0_i32_0 = arith.constant 0 : i32
    return %c0_i32, %arg0 : i32, i32
  }
}

</mosaic_0001>

<bundles_post_ra>
// kernel: tpu_custom_call.1
= control target key start
LH: loop header
LB: loop body
LE: loop exit
PB: predicated region body
PF: predicated region fallthrough
CT: control target
= control target key end

     0   :  { %vm41_vm0 = vcmask 261120   ;;  %v360_v2 = vmov 0   ;;  %vm142_vm1 = vcmask 130048   ;;  %v361_v20 = vmov 0.0|0.0   ;;  %s447_s0 = inlined_call_operand.vmem [shape: f32[2,32], index: 0, kind: input, shape index: {}]   ;;  %s448_s1 = inlined_call_operand.vmem [shape: f32[16,32], index: 1, kind: input, shape index: {}]   ;;  %s449_s2 = inlined_call_operand.vmem [shape: f32[16,1], index: 2, kind: input, shape index: {}]   ;;  %s450_s6 = inlined_call_operand.vmem [shape: f32[3,1], index: 6, kind: input, shape index: {}]   ;;  %s451_s3 = inlined_call_operand.vmem [shape: f32[16,16], index: 3, kind: input, shape index: {}]   ;;  %s452_s4 = inlined_call_operand.vmem [shape: f32[16,1], index: 4, kind: input, shape index: {}]   ;;  %s453_s5 = inlined_call_operand.vmem [shape: f32[3,16], index: 5, kind: input, shape index: {}]   ;;  %s454_s7 = inlined_call_operand.vmem [shape: f32[3,2], index: 7, kind: output, shape index: {}]  }
   0x1   :  { %v26_v0 = vld [vmem:[%s447_s0] sm:$0x3]  ;;  %358 = vset.pattern.permute.xlu0 %v360_v2  ;;  %359 = vset.pattern.permute.xlu1 %v360_v2  ;;  %v28_v4 = vld [vmem:[%s448_s1 + $0x8] sm:$0xff]  ;;  %vm362_vm2 = vmmov 0   ;;  %v363_v21 = vmov 0.0   ;;  %vm306_vm3 = vcmask 10240  }
   0x2   :  { %v27_v1 = vld [vmem:[%s448_s1] sm:$0xff]  ;;  %328 = vmatprep.subr.msk.mxu0 %vm41_vm0, %v26_v0  ;;  %v30_v5 = vld [vmem:[%s449_s2 + $0x8] sm:$0xff] }
   0x3   :  { %330 = vmatprep.mubr.msk.f32.mxu0 %vm41_vm0, %v27_v1  ;;  %v29_v3 = vld [vmem:[%s449_s2] sm:$0xff]  ;;  %329 = vmatpush3.xpose.msk.msra.mxu0 %vm41_vm0, %v26_v0  ;;  %v131_v9 = vld [vmem:[%s452_s4 + $0x8] sm:$0xff] }
   0x4   :  { %33 = vperm.xlu0 %358, %v29_v3   ;;  %v227_v6 = vld [vmem:[%s450_s6] sm:$0x7]  ;;  %v129_v19 = vld [vmem:[%s451_s3 + $0x8] sm:$0xff]  ;;  %351 = vmatprep.subr.bf16.mxu0 %v361_v20 }
   0x5   :  { %v128_v7 = vld [vmem:[%s451_s3] sm:$0xff] }
   0x6   :  { %331 = vmatmul.mubr.msk.f32.vlgmr.msra.gmra.mrb[0].mxu0 %vm41_vm0, %v28_v4  ;;  %337 = vmatprep.mubr.msk.f32.mxu1 %vm142_vm1, %v128_v7  ;;  %v130_v8 = vld [vmem:[%s452_s4] sm:$0xff] }
   0x7   :  { %134 = vperm.xlu1 %359, %v130_v8   ;;  %344 = vmatprep.mubr.msk.f32.mxu0 %vm362_vm2, %v363_v21  ;;  %v226_v31 = vld [vmem:[%s453_s5] sm:$0x7] }
   0x8   :  { %38 = vperm.xlu0 %358, %v30_v5  }
   0xb   :  { %139 = vperm.xlu1 %359, %v131_v9  }
   0xc   :  { %230 = vperm.xlu0 %358, %v227_v6  }
  0x83   :  { %v34_v10 = vpop.permute.xlu0 %33 }
  0x86   :  { %v135_v22 = vpop.permute.xlu1 %134 }
  0x87   :  { %v39_v11 = vpop.permute.xlu0 %38 }
  0x8a   :  { %v140_v23 = vpop.permute.xlu1 %139 }
  0x8b   :  { %v231_v32 = vpop.permute.xlu0 %230 }
  0xd9   :  { %v332_v12 = vpop.f32.mrb[0].mxu0 }
  0xda   :  { %v123_v13 = vadd.f32 %v332_v12, %v39_v11  ;;  %v117_v14 = vpop.f32.mrb[1].mxu0 }
  0xdb   :  { %v118_v15 = vadd.f32 %v117_v14, %v34_v10 }
  0xdc   :  { %v127_v16 = vmax.f32 %v123_v13, 0.0 }
  0xdd   :  { %v126_v17 = vmax.f32 %v118_v15, 0.0 }
  0xdf   :  { %v347_v18 = vpack.c.bf16 %v127_v16, %v126_v17 }
  0xe1   :  { %348 = vmatprep.subr.bf16.mxu1 %v347_v18 }
  0xe2   :  { %350 = vmatpush3.bf16.msra.mxu1 %v347_v18 }
  0xe5   :  { %338 = vmatmul.mubr.msk.f32.vlgmr.msra.gmra.mrb[0].mxu1 %vm142_vm1, %v129_v19 }
 0x1b8   :  { %v339_v24 = vpop.f32.mrb[0].mxu1 }
 0x1b9   :  { %v221_v25 = vadd.f32 %v339_v24, %v140_v23  ;;  %v215_v26 = vpop.f32.mrb[1].mxu1 }
 0x1ba   :  { %v216_v27 = vadd.f32 %v215_v26, %v135_v22 }
 0x1bb   :  { %v225_v28 = vmax.f32 %v221_v25, 0.0 }
 0x1bc   :  { %v224_v29 = vmax.f32 %v216_v27, 0.0 }
 0x1be   :  { %v352_v30 = vpack.c.bf16 %v225_v28, %v224_v29 }
 0x1c0   :  { %353 = vmatpush3.bf16.msra.mxu0 %v352_v30 }
 0x1c3   :  { %345 = vmatmul.mubr.msk.f32.vlgmr.msra.gmra.mrb[2].mxu0 %vm142_vm1, %v226_v31 }
 0x296   :  { %v302_v33 = vpop.f32.mrb[2].mxu0 }
 0x297   :  { %v303_v34 = vadd.f32 %v302_v33, %v231_v32  ;;  %v346_v35 = vpop.f32.mrb[3].mxu0 }
 0x299   :  { %307 = vst.msk [vmem:[%s454_s7] sm:$0x7] %vm306_vm3, %v303_v34 }

</bundles_post_ra>
